<compile_context>
chip_gen: v6e
topology: v6e:2x2x1
jax: 0.10.0
libtpu: 0.0.40
codegen_flags: <defaults>
</compile_context>

<pallas_src>
import jax
import jax.numpy as jnp
from jax.experimental import pallas as pl
from jax.experimental.pallas import tpu as pltpu


def _copy_kernel(idx_ref, x_ref, o_ref):
    # idx_ref (scalar prefetch) is consumed by the index_map; the body is a
    # pure VMEM tile copy — all the gather logic lives in the BlockSpecs.
    del idx_ref
    o_ref[...] = x_ref[...]


_LANE = 128
# Keep 2 buffers x (input tile + output tile) comfortably under the scoped
# VMEM default on every generation (v7x: 32 MiB scoped / 64 MiB physical).
_MAX_TILE_BYTES = 8 * 1024 * 1024


def channel_selection(x, indexes):
    """Pallas equivalent of ChannelSelection.forward for NCHW input."""
    N, C, H, W = x.shape
    indexes = list(indexes)
    S = len(indexes)

    # Identity only when the selection really is the identity selection.
    if indexes == list(range(C)):
        return x
    # All channels pruned -> empty output, no kernel launch.
    if S == 0:
        return x[:, :0, :, :]

    idx = jnp.asarray(indexes, dtype=jnp.int32)
    dtype_bytes = jnp.dtype(x.dtype).itemsize

    # Lane-dense layout: flatten H*W into (rows, 128) whenever possible.
    if (H * W) % _LANE == 0:
        rows, cols = (H * W) // _LANE, _LANE
    else:
        # TODO(synk): pad H*W up to a multiple of 128 for odd spatial maps;
        # current fallback is correct but lane-sparse.
        rows, cols = H, W
    x_r = x.reshape(N, C, rows, cols)

    # Fold batch into the block (short grid, big DMAs) unless the tile would
    # be too large for double-buffered VMEM; then keep N in the grid.
    tile_bytes = N * rows * cols * dtype_bytes
    fold_batch = tile_bytes <= _MAX_TILE_BYTES

    if fold_batch:
        grid = (S,)
        block = (N, 1, rows, cols)
        in_map = lambda c, idx_ref: (0, idx_ref[c], 0, 0)
        out_map = lambda c, idx_ref: (0, c, 0, 0)
        dim_sem = ("parallel",)
    else:
        grid = (N, S)
        block = (1, 1, rows, cols)
        in_map = lambda n, c, idx_ref: (n, idx_ref[c], 0, 0)
        out_map = lambda n, c, idx_ref: (n, c, 0, 0)
        dim_sem = ("parallel", "parallel")

    grid_spec = pltpu.PrefetchScalarGridSpec(
        num_scalar_prefetch=1,
        grid=grid,
        in_specs=[pl.BlockSpec(block, in_map)],
        out_specs=pl.BlockSpec(block, out_map),
    )

    out = pl.pallas_call(
        _copy_kernel,
        out_shape=jax.ShapeDtypeStruct((N, S, rows, cols), x.dtype),
        grid_spec=grid_spec,
        compiler_params=pltpu.CompilerParams(dimension_semantics=dim_sem),
        cost_estimate=pl.CostEstimate(
            flops=0,
            transcendentals=0,
            bytes_accessed=2 * N * S * H * W * dtype_bytes,
        ),
    )(idx, x_r)

    return out.reshape(N, S, H, W)


if __name__ == "__main__":
    key = jax.random.PRNGKey(0)

    # --- Case 1: lane-dense path (H*W = 256, multiple of 128) ---------------
    N, C, H, W = 2, 8, 16, 16
    x = jax.random.normal(key, (N, C, H, W), dtype=jnp.float32)
    indexes = [0, 2, 3, 6]
    out = jax.block_until_ready(channel_selection(x, indexes))
    ref = x[:, jnp.asarray(indexes), :, :]
    assert out.shape == (N, len(indexes), H, W), out.shape
    assert jnp.array_equal(out, ref), "mismatch vs reference gather (lane-dense)"

    # --- Case 2: identity path (indexes == range(C)) ------------------------
    out_full = jax.block_until_ready(channel_selection(x, list(range(C))))
    assert jnp.array_equal(out_full, x)

    # --- Case 3: permutation of length C must NOT take the identity path ----
    perm = list(range(C))[::-1]
    out_perm = jax.block_until_ready(channel_selection(x, perm))
    assert jnp.array_equal(out_perm, x[:, jnp.asarray(perm), :, :]), "perm mismatch"

    # --- Case 4: fallback path (H*W = 64, not a multiple of 128) ------------
    key2 = jax.random.PRNGKey(0)
    x_small = jax.random.normal(key2, (2, 6, 8, 8), dtype=jnp.float32)
    idx_small = [1, 4, 5]
    out_small = jax.block_until_ready(channel_selection(x_small, idx_small))
    assert jnp.array_equal(out_small, x_small[:, jnp.asarray(idx_small), :, :]), (
        "mismatch vs reference gather (fallback)")

    # --- Case 5: all channels pruned -----------------------------------------
    out_empty = channel_selection(x, [])
    assert out_empty.shape == (N, 0, H, W), out_empty.shape

    print("KERNEL_OK")
</pallas_src>

<mosaic_0001>
module attributes {stable_mosaic.version = 11 : i64} {
  func.func @_copy_kernel(%arg0: i32, %arg1: memref<4xi32, #tpu.memory_space<smem>>, %arg2: memref<2x1x2x128xf32, #tpu.memory_space<vmem>>, %arg3: memref<2x1x2x128xf32, #tpu.memory_space<vmem>>) attributes {dimension_semantics = [#tpu.dimension_semantics<parallel>], iteration_bounds = array<i64: 4>, scalar_prefetch = 1 : i64, scratch_operands = 0 : i64, tpu.core_type = #tpu.core_type<tc>, window_params = [{transform_indices = @transform_0, window_bounds = array<i64: 2, 1, 2, 128>}, {transform_indices = @transform_1, window_bounds = array<i64: 2, 1, 2, 128>}]} {
    %c0 = arith.constant 0 : index
    %c0_0 = arith.constant 0 : index
    %c0_1 = arith.constant 0 : index
    %c0_2 = arith.constant 0 : index
    %0 = vector.load %arg2[%c0, %c0_0, %c0_1, %c0_2] : memref<2x1x2x128xf32, #tpu.memory_space<vmem>>, vector<2x1x2x128xf32>
    %c0_3 = arith.constant 0 : index
    %c0_4 = arith.constant 0 : index
    %c0_5 = arith.constant 0 : index
    %c0_6 = arith.constant 0 : index
    %1 = vector.load %arg3[%c0_3, %c0_4, %c0_5, %c0_6] : memref<2x1x2x128xf32, #tpu.memory_space<vmem>>, vector<2x1x2x128xf32>
    tpu.vector_store %arg3[%c0_3, %c0_4, %c0_5, %c0_6], %0 {strides = array<i32>} : memref<2x1x2x128xf32, #tpu.memory_space<vmem>>, vector<2x1x2x128xf32>,
    return
  }
  func.func @transform_0(%arg0: i32, %arg1: memref<4xi32, #tpu.memory_space<smem>>) -> (i32, i32, i32, i32) {
    %0 = arith.index_cast %arg0 : i32 to index
    %1 = memref.load %arg1[%0] : memref<4xi32, #tpu.memory_space<smem>>
    %c0_i32 = arith.constant 0 : i32
    %c0_i32_0 = arith.constant 0 : i32
    %c0_i32_1 = arith.constant 0 : i32
    %c0_i32_2 = arith.constant 0 : i32
    return %c0_i32, %1, %c0_i32_0, %c0_i32_1 : i32, i32, i32, i32
  }
  func.func @transform_1(%arg0: i32, %arg1: memref<4xi32, #tpu.memory_space<smem>>) -> (i32, i32, i32, i32) {
    %c0_i32 = arith.constant 0 : i32
    %c0_i32_0 = arith.constant 0 : i32
    %c0_i32_1 = arith.constant 0 : i32
    %c0_i32_2 = arith.constant 0 : i32
    return %c0_i32, %arg0, %c0_i32_0, %c0_i32_1 : i32, i32, i32, i32
  }
}

</mosaic_0001>

<bundles_post_ra>
// kernel: tpu_custom_call.1
= control target key start
LH: loop header
LB: loop body
LE: loop exit
PB: predicated region body
PF: predicated region fallthrough
CT: control target
= control target key end

     0   :  { %s454_s9 = smov [#allocation3]   ;;  %s671_s0 = inlined_call_operand.hbm [shape: s32[4], index: 0, kind: input, shape index: {}]   ;;  %s672_s1 = inlined_call_operand.hbm [shape: f32[2,8,2,128], index: 1, kind: input, shape index: {}]   ;;  %s673_s2 = inlined_call_operand.hbm [shape: f32[2,4,2,128], index: 2, kind: output, shape index: {}]  }
   0x1   :  { %8 = dma.hbm_to_smem %s671_s0, 16, %s454_s9, [#allocation2] }
   0x2   :  { %416 = dma.done.wait [#allocation2], 16 }
   0x3   :  { %417 = vsyncadd [#allocation2], 4294967280 }
   0x4   :  { %10 = sfence }
   0x5   :  { %11 = vsyncpa [#allocation5], 0 }
   0x6   :  { %13 = vsyncpa [#allocation5 + $0x1], 0 }
   0x7   :  { %14 = vsyncpa [#allocation6], 0 }
   0x8   :  { %16 = vsyncpa [#allocation6 + $0x1], 0  ;;  %s481_s12 = smov 0   ;;  %s483_s13 = smov 0  }
   0x9   :  { %s485_s14 = smov 0   ;;  %s487_s15 = smov 0  }
   0xa   :  { %s489_s16 = smov 0   ;;  %s491_s17 = smov 0  }
   0xb   :  { %s493_s0 = smov 0  }
   0xc LB: > { %s515_s18 = sadd.s32 4294967295, %s452_s0   ;;  %s233_s19 = sadd.s32 4294967294, %s452_s0   ;;  %s452_s0 = sphi %s493_s0, %s692_s0   ;;  %s448_s17 = sphi %s491_s17, %s691_s17   ;;  %s444_s16 = sphi %s489_s16, %s690_s16   ;;  %s440_s15 = sphi %s487_s15, %s689_s15   ;;  %s436_s14 = sphi %s485_s14, %s688_s14   ;;  %s432_s13 = sphi %s483_s13, %s687_s13   ;;  %s428_s12 = sphi %s481_s12, %s686_s12  }
   0xd   : > { %s519_s20 = sadd.s32 1, %s452_s0   ;;  %s26_s21 = sld [smem:[#allocation3 + %s452_s0]] }
   0xe   : > { %s27_s22 = sld [smem:[#allocation3 + %s519_s20]]  ;;  %s31_s23 = sadd.s32 1, %s448_s17 }
   0xf   : > { %p38_p0 = scmp.ne.s32.totalorder %s448_s17, %s444_s16  ;;  %p39_p1 = scmp.eq.s32.totalorder %s452_s0, 0 }
  0x10   : > { %p44_p2 = scmp.ne.s32.totalorder %s444_s16, %s440_s15  ;;  %p45_p3 = scmp.eq.s32.totalorder %s515_s18, 0 }
  0x11   : > { %p529_p4 = por %p39_p1, %p38_p0  ;;  %s54_s25 = ssub.s32 %s452_s0, %s519_s20 }
  0x12   : > { %p535_p5 = por %p45_p3, %p44_p2  ;;  %p55_p6 = scmp.eq.s32.totalorder %s54_s25, 0 }
  0x13   : > { %s57_s27 = sadd.s32 1, %s436_s14  ;;  %p67_p7 = scmp.ne.s32.totalorder %s436_s14, %s432_s13 }
  0x14   : > { %s677_s26 = scalar_select %p535_p5, 1, 0 }
  0x15   : > { %s28_s28 = ssub.s32 %s26_s21, %s27_s22  ;;  %p68_p8 = scmp.eq.s32.totalorder %s515_s18, 3 }
  0x16   : > { %p29_p9 = scmp.eq.s32.totalorder %s28_s28, 0  ;;  %p73_p10 = scmp.ne.s32.totalorder %s432_s13, %s428_s12 }
  0x17   : > { %s546_s29 = scalar_select %p55_p6, %s436_s14, %s57_s27  }
  0x18   : > { %s549_s30 = scalar_select %p29_p9, %s448_s17, %s31_s23  }
  0x19   : > { %p551_p11 = por %p68_p8, %p67_p7  ;;  %p74_p12 = scmp.eq.s32.totalorder %s233_s19, 3 }
  0x1a   : > { %p261_p13 = scmp.lt.s32.totalorder %s452_s0, 4  ;;  %s94_s5 = sand.u32 1, %s448_s17  }
  0x1b   : > { %s678_s3 = scalar_select %p551_p11, 1, 0 }
  0x1c   : > { %p556_p0 = por %p74_p12, %p73_p10  ;;  %s236_s6 = sshll.u32 %s94_s5, 2 }
  0x1d   : > { %p563_p1 = pnand %p261_p13, %p529_p4  ;;  %s98_s11 = scalar_lea.vmem [#allocation4], %s236_s6 }
  0x1e   : > { %s679_s4 = scalar_select %p556_p0, 1, 0 }
  0x1f   : > { %s245_s8 = scalar_select %p529_p4, [#allocation3], [#allocation8] }
  0x20   : > { %s246_s9 = scalar_select %p529_p4, %s452_s0, 0 }
  0x21   : > { %s694_s8 = smov (!%p261_p13, %s245_s8), [#allocation9]  ;;  %s105_s15 = sshll.u32 %s98_s11, 4  ;;  %s573_s15 = int_to_ptr.vmem [resolvable:$true] %s105_s15 }
  0x22   : > { %s696_s9 = smov (!%p261_p13, %s246_s9), 0  ;;  %p238_p2 = scmp.ge.s32.totalorder %s452_s0, 1 }
  0x23   : > { %s99_s10 = sld [smem:[%s694_s8 + %s696_s9]]  ;;  %p113_p3 = scmp.lt.s32.totalorder %s452_s0, 5 }
  0x24   : > { %s585_s25 = scalar_lea.sflag [#allocation5], %s94_s5  ;;  %p336_p7 = pneg %p563_p1 }
  0x25   : > { %p576_p6 = pnand %p238_p2, %p113_p3  ;;  %s339_s8 = scalar_lea.hbm %s672_s1, 512 }
  0x27   : > { %s681_s19 = scalar_select %p576_p6, 1, 0 }
  0x29   : > { %s237_s21 = sshll.u32 %s99_s10, 5 }
  0x2a   : > { %s583_s24 = scalar_lea.hbm %s672_s1, %s237_s21 }
  0x2b   : > { %s334_s27 = scalar_lea.hbm %s583_s24, 64  ;;  %p340_p10 = scmp.lt.s32.totalorder %s583_s24, %s672_s1 }
  0x2c   : > { %p335_p4 = scmp.ne.s32.totalorder %s583_s24, %s334_s27  ;;  %p341_p12 = scmp.lt.s32.totalorder %s339_s8, %s334_s27 }
  0x2e   : > { %p337_p8 = pnand %p336_p7, %p335_p4  ;;  %p342_p13 = por %p341_p12, %p340_p10 }
  0x30   : > { %p338_p9 = pneg %p337_p8 }
  0x32   : > { %p343_p2 = pnand %p342_p13, %p338_p9 }
  0x34   : > { %346 = shalt.err (!%p343_p2)
}
  0x35   : > { %s347_s5 = scalar_lea.vmem %s573_s15, 64  ;;  %s455_s11 = smov [#allocation4]  }
  0x36   : > { %p348_p3 = scmp.ne.s32.totalorder %s573_s15, %s347_s5  ;;  %s352_s21 = sshll.u32 %s455_s11, 4  ;;  %s353_s21 = int_to_ptr.vmem [resolvable:$false] %s352_s21 }
  0x37   : > { %s354_s22 = scalar_lea.vmem %s353_s21, 128  ;;  %p355_p8 = scmp.lt.s32.totalorder %s573_s15, %s353_s21 }
  0x38   : > { %p350_p0 = pnand %p348_p3, %p336_p7  ;;  %p356_p11 = scmp.lt.s32.totalorder %s354_s22, %s347_s5 }
  0x3a   : > { %p351_p4 = pneg %p350_p0  ;;  %p357_p5 = por %p356_p11, %p355_p8 }
  0x3c   : > { %p358_p6 = pnand %p357_p5, %p351_p4 }
  0x3e   : > { %361 = shalt.err (!%p358_p6)
}
  0x3f   : > { %s456_s23 = smov 256   ;;  %s457_s27 = smov 32  }
  0x40   : > { %s458_s28 = smov 2   ;;  %p682_p0 = scmp.ne.s32.totalorder %s681_s19, 0 }
  0x41   : > { %256 = dma.hbm_to_vmem [thread:$0]  (!%p563_p1), %s583_s24, 64, %s573_s15, %s585_s25, %s456_s23, %s457_s27, %s458_s28  }
  0x42   : > { %117 = sbr.rel (%p682_p0) target bundleno = 99 (0x63), region = 24  ;;  %s119_s6 = sand.u32 (!%p682_p0), 1, %s444_s16  }
  0x43   : > { %s239_s8 = sshll.u32 (!%p682_p0), %s119_s6, 2  ;;  %s120_s9 = scalar_lea.sflag (!%p682_p0), [#allocation5], %s119_s6 }
  0x44   : > { %s123_s10 = scalar_lea.vmem (!%p682_p0), [#allocation4], %s239_s8  ;;  %p683_p5 = scmp.ne.s32.totalorder (!%p682_p0), %s677_s26, 0 }
  0x47   : > { %419 = dma.done.wait (%p683_p5), %s120_s9, 64  }
  0x48   : > { %421 = vsyncadd (%p683_p5), %s120_s9, 4294967232  ;;  %s139_s5 = sand.u32 1, %s432_s13   ;;  %s242_s15 = sshll.u32 %s515_s18, 5  ;;  %v143_v0 = vld [vmem:[%s123_s10] sm:$0xf]  }
  0x49   : > { %s240_s7 = sshll.u32 %s139_s5, 2  ;;  %s618_s21 = scalar_lea.hbm %s673_s2, %s242_s15 }
  0x4a   : > { %s141_s24 = scalar_lea.vmem [#allocation7], %s240_s7  ;;  %s622_s26 = scalar_lea.sflag [#allocation6], %s139_s5 }
  0x4b   : > { %s160_s19 = sshll.u32 %s141_s24, 4  ;;  %145 = vst [vmem:[%s141_s24] sm:$0xf] %v143_v0   ;;  %p684_p1 = scmp.ne.s32.totalorder %s678_s3, 0  ;;  %s620_s19 = int_to_ptr.vmem [resolvable:$true] %s160_s19 }
  0x4c   : > { %s362_s22 = scalar_lea.vmem %s620_s19, 64  ;;  %s459_s18 = smov [#allocation7]  }
  0x4d   : > { %p363_p11 = scmp.ne.s32.totalorder %s620_s19, %s362_s22  ;;  %s366_s23 = sshll.u32 %s459_s18, 4  ;;  %s367_s23 = int_to_ptr.vmem [resolvable:$false] %s366_s23 }
  0x4e   : > { %s368_s27 = scalar_lea.vmem %s367_s23, 128  ;;  %p369_p9 = scmp.lt.s32.totalorder %s620_s19, %s367_s23 }
  0x4f   : > { %p364_p6 = pnand %p363_p11, %p684_p1  ;;  %p370_p10 = scmp.lt.s32.totalorder %s368_s27, %s362_s22 }
  0x51   : > { %p365_p7 = pneg %p364_p6  ;;  %p371_p12 = por %p370_p10, %p369_p9 }
  0x53   : > { %p372_p13 = pnand %p371_p12, %p365_p7 }
  0x55   : > { %375 = shalt.err (!%p372_p13)
}
  0x56   : > { %s376_s28 = scalar_lea.hbm %s618_s21, 64  ;;  %s380_s9 = scalar_lea.hbm %s673_s2, 256 }
  0x57   : > { %p377_p2 = scmp.ne.s32.totalorder %s618_s21, %s376_s28  ;;  %p381_p8 = scmp.lt.s32.totalorder %s618_s21, %s673_s2 }
  0x58   : > { %p382_p0 = scmp.lt.s32.totalorder %s380_s9, %s376_s28 }
  0x59   : > { %p378_p3 = pnand %p377_p2, %p684_p1 }
  0x5a   : > { %p383_p5 = por %p382_p0, %p381_p8 }
  0x5b   : > { %p379_p4 = pneg %p378_p3 }
  0x5d   : > { %p384_p11 = pnand %p383_p5, %p379_p4 }
  0x5f   : > { %387 = shalt.err (!%p384_p11)
}
  0x60   : > { %s460_s7 = smov 32   ;;  %s461_s15 = smov 128  }
  0x61   : > { %s462_s24 = smov 2  }
  0x62   : > { %249 = dma.vmem_to_hbm [thread:$0]  (%p684_p1), %s620_s19, 64, %s618_s21, %s622_s26, %s460_s7, %s461_s15, %s462_s24  }
  0x63 PF: > { %p262_p6 = scmp.ge.s32.totalorder %s452_s0, 2  ;;  %s175_s25 = sand.u32 1, %s428_s12  }
  0x64   : > { %p685_p7 = scmp.ne.s32.totalorder %s679_s4, 0  ;;  %s176_s11 = scalar_lea.sflag [#allocation6], %s175_s25 }
  0x66   : > { %p258_p9 = pnand %p262_p6, %p685_p7 }
  0x68   : > { %p259_p10 = pneg %p258_p9 }
  0x6a   : > { %423 = dma.done.wait (%p259_p10), %s176_s11, 64  }
  0x6b   : > { %425 = vsyncadd (%p259_p10), %s176_s11, 4294967232  ;;  %p19_p1 = scmp.ge.s32.totalorder %s519_s20, 6   ;;  %s686_s12 = smov %s432_s13 }
  0x6c   : > { %s687_s13 = smov %s436_s14  ;;  %s688_s14 = smov %s546_s29 }
  0x6d   : > { %s689_s15 = smov %s444_s16  ;;  %s690_s16 = smov %s448_s17 }
  0x6e   : > { %s691_s17 = smov %s549_s30  ;;  %s692_s0 = smov %s519_s20 }
  0x6f   :  { %21 = sbr.rel (!%p19_p1) target bundleno = 12 (0xc), region = 69 }
  0x74   :  { %181 = vsyncpa [#allocation5], 1 }
  0x75   :  { %183 = vsyncpa [#allocation5 + $0x1], 1 }
  0x76   :  { %184 = vsyncpa [#allocation6], 1 }
  0x77   :  { %186 = vsyncpa [#allocation6 + $0x1], 1 }

</bundles_post_ra>
